<compile_context>
chip_gen: v5e
topology: v5e:2x2
jax: 0.10.0
libtpu: 0.0.40
codegen_flags: <defaults>
</compile_context>

<pallas_src>
import math

import jax
import jax.numpy as jnp
from jax.experimental import pallas as pl
from jax.experimental.pallas import tpu as pltpu

IN_FEATURES = 784
OUT_FEATURES = 10
N_PAD = 128             # lane-dense output width (matches 128-wide MXU/lanes)
MAX_BATCH_TILE = 2048   # f32 x tile 2048x784x4 ~= 6.4 MiB, 2x double-buffered


def _linear_kernel(x_ref, w_ref, b_ref, o_ref):
    # x_ref: (TB, 784) f32, w_ref: (784, 128) bf16,
    # b_ref: (1, 128) f32,  o_ref: (TB, 128) f32
    x = x_ref[...].astype(jnp.bfloat16)          # in-kernel cast, hidden under DMA
    acc = jnp.dot(x, w_ref[...], preferred_element_type=jnp.float32)
    o_ref[...] = acc + b_ref[...]


def prepare_params(weight, bias):
    """One-time, hoisted param prep.

    weight: (10, 784) f32 (PyTorch nn.Linear layout); bias: (10,) f32.
    Returns lane-padded, pre-transposed (784, 128) bf16 weight and (1, 128)
    f32 bias (padded lanes are zero, so they contribute nothing).
    """
    n, d = weight.shape
    w_t = jnp.zeros((d, N_PAD), jnp.bfloat16)
    w_t = w_t.at[:, :n].set(weight.T.astype(jnp.bfloat16))
    b2d = jnp.zeros((1, N_PAD), jnp.float32)
    b2d = b2d.at[:, :n].set(bias.astype(jnp.float32))
    return w_t, b2d


def mnist_logistic_forward(x, w_t, b2d):
    """x: (B, 784) f32; w_t: (784, 128) bf16 (pre-padded); b2d: (1, 128) f32."""
    B, D = x.shape
    Np = w_t.shape[1]

    # Batch tile: full batch if it fits, else a big fixed tile (multiple of 8);
    # ragged last block is handled by Pallas (masked writes), no jnp.pad.
    TB = B if B <= MAX_BATCH_TILE else MAX_BATCH_TILE
    grid = (pl.cdiv(B, TB),)

    out = pl.pallas_call(
        _linear_kernel,
        out_shape=jax.ShapeDtypeStruct((B, Np), jnp.float32),
        grid=grid,
        in_specs=[
            # x tile: pipelined/double-buffered over the batch axis
            pl.BlockSpec((TB, D), lambda i: (i, 0)),
            # resident operands: constant index_map, single buffer is enough
            pl.BlockSpec((D, Np), lambda i: (0, 0), pipeline_mode=pl.Buffered(1)),
            pl.BlockSpec((1, Np), lambda i: (0, 0), pipeline_mode=pl.Buffered(1)),
        ],
        out_specs=pl.BlockSpec((TB, Np), lambda i: (i, 0)),
        compiler_params=pltpu.CompilerParams(
            dimension_semantics=("parallel",),
            # ~2*6.4 MiB (f32 x) + ~2*1 MiB (f32 out) + ~0.2 MiB (weights/bias)
            # at TB=2048; 48 MiB leaves headroom and stays under v7x's 64 MiB.
            vmem_limit_bytes=48 * 1024 * 1024,
        ),
        cost_estimate=pl.CostEstimate(
            flops=2 * B * D * Np,
            transcendentals=0,
            bytes_accessed=(B * D * 4) + (D * Np * 2) + (Np * 4) + (B * Np * 4),
        ),
    )(x, w_t, b2d)

    # Slice away the lane padding (back to the logical 10 classes).
    # TODO(synk): fuse downstream log-softmax/NLL here to avoid this extra pass.
    return out[:, :OUT_FEATURES]


def _init_params(key):
    """Deterministic init matching torch.nn.Linear(784, 10) default init:
    U(-1/sqrt(in_features), 1/sqrt(in_features)) for weight and bias."""
    bound = 1.0 / math.sqrt(IN_FEATURES)
    kw, kb = jax.random.split(key)
    weight = jax.random.uniform(
        kw, (OUT_FEATURES, IN_FEATURES), jnp.float32, minval=-bound, maxval=bound
    )
    bias = jax.random.uniform(
        kb, (OUT_FEATURES,), jnp.float32, minval=-bound, maxval=bound
    )
    return weight, bias


if __name__ == "__main__":
    key = jax.random.PRNGKey(0)
    k_params, k_x = jax.random.split(key)

    weight, bias = _init_params(k_params)
    w_t, b2d = prepare_params(weight, bias)   # one-time, hoisted prep

    batch = 8
    x = jax.random.normal(k_x, (batch, IN_FEATURES), dtype=jnp.float32)

    out = mnist_logistic_forward(x, w_t, b2d)
    out = jax.block_until_ready(out)

    # sanity check against plain JAX f32 reference (bf16 matmul -> loose tol)
    ref = x @ weight.T + bias
    assert out.shape == (batch, OUT_FEATURES)
    assert jnp.allclose(out, ref, atol=2e-2, rtol=2e-2), (
        f"max abs err {jnp.max(jnp.abs(out - ref))}"
    )

    print("KERNEL_OK")
</pallas_src>

<mosaic_0001>
module attributes {stable_mosaic.version = 11 : i64} {
  func.func @_linear_kernel(%arg0: i32, %arg1: memref<8x784xf32, #tpu.memory_space<vmem>>, %arg2: memref<784x128xbf16, #tpu.memory_space<vmem>>, %arg3: memref<1x128xf32, #tpu.memory_space<vmem>>, %arg4: memref<8x128xf32, #tpu.memory_space<vmem>>) attributes {dimension_semantics = [#tpu.dimension_semantics<parallel>], iteration_bounds = array<i64: 1>, scalar_prefetch = 0 : i64, scratch_operands = 0 : i64, tpu.core_type = #tpu.core_type<tc>, window_params = [{transform_indices = @transform_0, window_bounds = array<i64: 8, 784>}, {pipeline_mode = #tpu.pipeline_mode<synchronous>, transform_indices = @transform_1, window_bounds = array<i64: 784, 128>}, {pipeline_mode = #tpu.pipeline_mode<synchronous>, transform_indices = @transform_2, window_bounds = array<i64: 1, 128>}, {transform_indices = @transform_3, window_bounds = array<i64: 8, 128>}]} {
    %c0 = arith.constant 0 : index
    %c0_0 = arith.constant 0 : index
    %0 = vector.load %arg1[%c0, %c0_0] : memref<8x784xf32, #tpu.memory_space<vmem>>, vector<8x784xf32>
    %1 = arith.truncf %0 : vector<8x784xf32> to vector<8x784xbf16>
    %c0_1 = arith.constant 0 : index
    %c0_2 = arith.constant 0 : index
    %2 = vector.load %arg2[%c0_1, %c0_2] : memref<784x128xbf16, #tpu.memory_space<vmem>>, vector<784x128xbf16>
    %cst = arith.constant dense<0.000000e+00> : vector<8x128xf32>
    %3 = tpu.matmul %1, %2, %cst {dimension_numbers = #tpu.dot_dimension_numbers<[1], [0], [0], [1], [0, 0, 1, 1], [], []>} : vector<8x784xbf16>, vector<784x128xbf16>, vector<8x128xf32> -> vector<8x128xf32>
    %c0_3 = arith.constant 0 : index
    %c0_4 = arith.constant 0 : index
    %4 = vector.load %arg3[%c0_3, %c0_4] : memref<1x128xf32, #tpu.memory_space<vmem>>, vector<1x128xf32>
    %5 = vector.broadcast %4 : vector<1x128xf32> to vector<8x128xf32>
    %6 = arith.addf %3, %5 : vector<8x128xf32>
    %c0_5 = arith.constant 0 : index
    %c0_6 = arith.constant 0 : index
    %7 = vector.load %arg4[%c0_5, %c0_6] : memref<8x128xf32, #tpu.memory_space<vmem>>, vector<8x128xf32>
    tpu.vector_store %arg4[%c0_5, %c0_6], %6 {strides = array<i32>} : memref<8x128xf32, #tpu.memory_space<vmem>>, vector<8x128xf32>,
    return
  }
  func.func @transform_0(%arg0: i32) -> (i32, i32) {
    %c0_i32 = arith.constant 0 : i32
    %c0_i32_0 = arith.constant 0 : i32
    return %arg0, %c0_i32 : i32, i32
  }
  func.func @transform_1(%arg0: i32) -> (i32, i32) {
    %c0_i32 = arith.constant 0 : i32
    %c0_i32_0 = arith.constant 0 : i32
    %c0_i32_1 = arith.constant 0 : i32
    return %c0_i32, %c0_i32_0 : i32, i32
  }
  func.func @transform_2(%arg0: i32) -> (i32, i32) {
    %c0_i32 = arith.constant 0 : i32
    %c0_i32_0 = arith.constant 0 : i32
    %c0_i32_1 = arith.constant 0 : i32
    return %c0_i32, %c0_i32_0 : i32, i32
  }
  func.func @transform_3(%arg0: i32) -> (i32, i32) {
    %c0_i32 = arith.constant 0 : i32
    %c0_i32_0 = arith.constant 0 : i32
    return %arg0, %c0_i32 : i32, i32
  }
}

</mosaic_0001>

<bundles_post_ra>
// kernel: tpu_custom_call.1
= control target key start
LH: loop header
LB: loop body
LE: loop exit
PB: predicated region body
PF: predicated region fallthrough
CT: control target
= control target key end

     0   :  { %8 = vsyncpa [#allocation3], 0  ;;  %s937_s0 = inlined_call_operand.hbm [shape: f32[8,784], index: 0, kind: input, shape index: {}]   ;;  %s938_s1 = inlined_call_operand.hbm [shape: bf16[784,128], index: 1, kind: input, shape index: {}]   ;;  %s939_s2 = inlined_call_operand.vmem [shape: f32[1,128], index: 2, kind: input, shape index: {}]   ;;  %s940_s3 = inlined_call_operand.hbm [shape: f32[8,128], index: 3, kind: output, shape index: {}]  }
   0x1   :  { %9 = vsyncpa [#allocation6], 0 }
   0x2   :  { %10 = vsyncpa [#allocation4], 0  ;;  %s16_s14 = sshll.u32 %s937_s0, 4  ;;  %s900_s15 = smov [#allocation2]   ;;  %s17_s14 = int_to_ptr.hbm [resolvable:$true] %s16_s14 }
   0x3   :  { %s18_s16 = sshll.u32 %s900_s15, 4  ;;  %s26_s19 = sshll.u32 %s938_s1, 4  ;;  %s19_s16 = int_to_ptr.vmem [resolvable:$true] %s18_s16  ;;  %s27_s19 = int_to_ptr.hbm [resolvable:$true] %s26_s19 }
   0x4   :  { %21 = dma.hbm_to_vmem [thread:$0]  %s17_s14, 896, %s19_s16, [#allocation3]  }
   0x5   :  { %s901_s20 = smov [#allocation5]   ;;  %s902_s22 = smov 64  }
   0x6   :  { %s28_s21 = sshll.u32 %s901_s20, 4  ;;  %s903_s23 = smov 4   ;;  %s29_s21 = int_to_ptr.vmem [resolvable:$true] %s28_s21 }
   0x7   :  { %34 = dma.hbm_to_vmem [thread:$0]  %s27_s19, 6272, %s29_s21, [#allocation6], %s902_s22, %s902_s22, %s903_s23  }
   0x8   :  { %894 = dma.done.wait [#allocation3], 896  }
   0x9   :  { %895 = vsyncadd [#allocation3], 4294966400 }
   0xa   :  { %896 = dma.done.wait [#allocation6], 6272  }
   0xb   :  { %897 = vsyncadd [#allocation6], 4294961024  ;;  %v774_v0 = vld [vmem:[#allocation5 + $0x38] sm:$0xff]  ;;  %v773_v3 = vld [vmem:[#allocation5 + $0x30] sm:$0xff]  ;;  %vm456_vm0 = vcmask 130048   ;;  %s904_s24 = smov [#allocation7]  }
   0xc   :  { %v782_v1 = vld [vmem:[#allocation5 + $0x78] sm:$0xff]  ;;  %460 = vmatpush.bf16.msra.mxu0 %v774_v0  ;;  %v781_v4 = vld [vmem:[#allocation5 + $0x70] sm:$0xff]  ;;  %v772_v8 = vld [vmem:[#allocation5 + $0x28] sm:$0xff]  ;;  %s557_s25 = sshll.u32 %s904_s24, 4  ;;  %s559_s28 = sshll.u32 %s940_s3, 4  ;;  %s558_s25 = int_to_ptr.vmem [resolvable:$true] %s557_s25  ;;  %s560_s28 = int_to_ptr.hbm [resolvable:$true] %s559_s28 }
   0xd   :  { %v790_v2 = vld [vmem:[#allocation5 + $0xb8] sm:$0xff]  ;;  %473 = vmatpush.bf16.msra.mxu1 %v782_v1  ;;  %v789_v5 = vld [vmem:[#allocation5 + $0xb0] sm:$0xff]  ;;  %v780_v9 = vld [vmem:[#allocation5 + $0x68] sm:$0xff] }
   0xe   :  { %486 = vmatpush.bf16.msra.mxu2 %v790_v2  ;;  %v798_v6 = vld [vmem:[#allocation5 + $0xf8] sm:$0xff]  ;;  %v797_v7 = vld [vmem:[#allocation5 + $0xf0] sm:$0xff]  ;;  %v788_v10 = vld [vmem:[#allocation5 + $0xa8] sm:$0xff] }
   0xf   :  { %499 = vmatpush.bf16.msra.mxu3 %v798_v6  ;;  %v796_v11 = vld [vmem:[#allocation5 + $0xe8] sm:$0xff]  ;;  %v771_v12 = vld [vmem:[#allocation5 + $0x20] sm:$0xff]  ;;  %v770_v16 = vld [vmem:[#allocation5 + $0x18] sm:$0xff] }
  0x10   :  { %461 = vmatpush.bf16.msra.mxu0 %v773_v3  ;;  %v779_v13 = vld [vmem:[#allocation5 + $0x60] sm:$0xff]  ;;  %v778_v17 = vld [vmem:[#allocation5 + $0x58] sm:$0xff]  ;;  %v769_v20 = vld [vmem:[#allocation5 + $0x10] sm:$0xff] }
  0x11   :  { %474 = vmatpush.bf16.msra.mxu1 %v781_v4  ;;  %v787_v14 = vld [vmem:[#allocation5 + $0xa0] sm:$0xff]  ;;  %v786_v18 = vld [vmem:[#allocation5 + $0x98] sm:$0xff]  ;;  %v777_v21 = vld [vmem:[#allocation5 + $0x50] sm:$0xff] }
  0x12   :  { %487 = vmatpush.bf16.msra.mxu2 %v789_v5  ;;  %v795_v15 = vld [vmem:[#allocation5 + $0xe0] sm:$0xff]  ;;  %v794_v19 = vld [vmem:[#allocation5 + $0xd8] sm:$0xff]  ;;  %v785_v22 = vld [vmem:[#allocation5 + $0x90] sm:$0xff] }
  0x13   :  { %500 = vmatpush.bf16.msra.mxu3 %v797_v7  ;;  %v793_v23 = vld [vmem:[#allocation5 + $0xd0] sm:$0xff]  ;;  %v768_v24 = vld [vmem:[#allocation5 + $0x8] sm:$0xff]  ;;  %v767_v27 = vld [vmem:[#allocation5] sm:$0xff] }
  0x14   :  { %462 = vmatpush.bf16.msra.mxu0 %v772_v8  ;;  %v776_v25 = vld [vmem:[#allocation5 + $0x48] sm:$0xff]  ;;  %v775_v29 = vld [vmem:[#allocation5 + $0x40] sm:$0xff]  ;;  %v47_v31 = vld [vmem:[#allocation2 + $0x8] sm:$0xff] }
  0x15   :  { %475 = vmatpush.bf16.msra.mxu1 %v780_v9  ;;  %v784_v26 = vld [vmem:[#allocation5 + $0x88] sm:$0xff]  ;;  %v783_v32 = vld [vmem:[#allocation5 + $0x80] sm:$0xff]  ;;  %v806_v33 = vld [vmem:[#allocation5 + $0x138] sm:$0xff]  ;;  %v54_v38 = vpack.c.bf16 %v47_v31, %v47_v31 }
  0x16   :  { %488 = vmatpush.bf16.msra.mxu2 %v788_v10  ;;  %v792_v28 = vld [vmem:[#allocation5 + $0xc8] sm:$0xff]  ;;  %v48_v34 = vld [vmem:[#allocation2 + $0x10] sm:$0xff]  ;;  %v815_v36 = vld [vmem:[#allocation5 + $0x180] sm:$0xff] }
  0x17   :  { %501 = vmatpush.bf16.msra.mxu3 %v796_v11  ;;  %v46_v30 = vld [vmem:[#allocation2] sm:$0xff]  ;;  %v814_v35 = vld [vmem:[#allocation5 + $0x178] sm:$0xff]  ;;  %v55_v39 = vpack.c.bf16 %v48_v34, %v48_v34  ;;  %v791_v40 = vld [vmem:[#allocation5 + $0xc0] sm:$0xff] }
  0x18   :  { %463 = vmatpush.bf16.msra.mxu0 %v771_v12  ;;  %v53_v37 = vpack.c.bf16 %v46_v30, %v46_v30  ;;  %v49_v41 = vld [vmem:[#allocation2 + $0x18] sm:$0xff]  ;;  %v805_v42 = vld [vmem:[#allocation5 + $0x130] sm:$0xff]  ;;  %v804_v45 = vld [vmem:[#allocation5 + $0x128] sm:$0xff] }
  0x19   :  { %476 = vmatpush.bf16.msra.mxu1 %v779_v13  ;;  %v813_v43 = vld [vmem:[#allocation5 + $0x170] sm:$0xff]  ;;  %v56_v44 = vpack.c.bf16 %v49_v41, %v49_v41  ;;  %v812_v46 = vld [vmem:[#allocation5 + $0x168] sm:$0xff]  ;;  %v803_v47 = vld [vmem:[#allocation5 + $0x120] sm:$0xff] }
  0x1a   :  { %489 = vmatpush.bf16.msra.mxu2 %v787_v14  ;;  %v811_v48 = vld [vmem:[#allocation5 + $0x160] sm:$0xff]  ;;  %v802_v49 = vld [vmem:[#allocation5 + $0x118] sm:$0xff]  ;;  %v801_v53 = vld [vmem:[#allocation5 + $0x110] sm:$0xff] }
  0x1b   :  { %502 = vmatpush.bf16.msra.mxu3 %v795_v15  ;;  %v52_v50 = vld [vmem:[#allocation2 + $0x30] sm:$0xff]  ;;  %v809_v54 = vld [vmem:[#allocation5 + $0x150] sm:$0xff]  ;;  %v800_v55 = vld [vmem:[#allocation5 + $0x108] sm:$0xff] }
  0x1c   :  { %464 = vmatpush.bf16.msra.mxu0 %v770_v16  ;;  %v810_v51 = vld [vmem:[#allocation5 + $0x158] sm:$0xff]  ;;  %v59_v52 = vpack.c.bf16 %v52_v50, %v52_v50  ;;  %v808_v56 = vld [vmem:[#allocation5 + $0x148] sm:$0xff]  ;;  %v799_v57 = vld [vmem:[#allocation5 + $0x100] sm:$0xff] }
  0x1d   :  { %477 = vmatpush.bf16.msra.mxu1 %v778_v17  ;;  %v50_v58 = vld [vmem:[#allocation2 + $0x20] sm:$0xff]  ;;  %v807_v59 = vld [vmem:[#allocation5 + $0x140] sm:$0xff]  ;;  %v51_v60 = vld [vmem:[#allocation2 + $0x28] sm:$0xff] }
  0x1e   :  { %490 = vmatpush.bf16.msra.mxu2 %v786_v18  ;;  %v57_v61 = vpack.c.bf16 %v50_v58, %v50_v58  ;;  %v58_v62 = vpack.c.bf16 %v51_v60, %v51_v60  ;;  %v821_v5 = vld [vmem:[%s939_s2] ss:$0 sm:$0xff] }
  0x1f   :  { %503 = vmatpush.bf16.msra.mxu3 %v794_v19 }
  0x20   :  { %465 = vmatpush.bf16.msra.mxu0 %v769_v20 }
  0x21   :  { %478 = vmatpush.bf16.msra.mxu1 %v777_v21 }
  0x22   :  { %491 = vmatpush.bf16.msra.mxu2 %v785_v22 }
  0x23   :  { %504 = vmatpush.bf16.msra.mxu3 %v793_v23 }
  0x24   :  { %466 = vmatpush.bf16.msra.mxu0 %v768_v24 }
  0x25   :  { %479 = vmatpush.bf16.msra.mxu1 %v776_v25 }
  0x26   :  { %492 = vmatpush.bf16.msra.mxu2 %v784_v26 }
  0x27   :  { %505 = vmatpush.bf16.msra.mxu3 %v792_v28 }
  0x28   :  { %467 = vmatpush.bf16.msra.mxu0 %v767_v27 }
  0x29   :  { %480 = vmatpush.bf16.msra.mxu1 %v775_v29 }
  0x2a   :  { %493 = vmatpush.bf16.msra.mxu2 %v783_v32 }
  0x2b   :  { %468 = vmatmul.bf16.vlgmr.msra.gmra.mxu0 %v53_v37  ;;  %506 = vmatpush.bf16.msra.mxu3 %v791_v40 }
  0x2c   :  { %512 = vmatpush.bf16.msrb.mxu0 %v806_v33  ;;  %481 = vmatmul.bf16.vlgmr.msra.gmra.mxu1 %v54_v38 }
  0x2d   :  { %525 = vmatpush.bf16.msrb.mxu1 %v814_v35  ;;  %494 = vmatmul.bf16.vlgmr.msra.gmra.mxu2 %v55_v39 }
  0x2e   :  { %545 = vmatpush.bf16.msrb.mxu2 %v815_v36  ;;  %507 = vmatmul.bf16.vlgmr.msra.gmra.mxu3 %v56_v44 }
  0x30   :  { %513 = vmatpush.bf16.msrb.mxu0 %v805_v42 }
  0x31   :  { %526 = vmatpush.bf16.msrb.mxu1 %v813_v43 }
  0x34   :  { %514 = vmatpush.bf16.msrb.mxu0 %v804_v45 }
  0x35   :  { %527 = vmatpush.bf16.msrb.mxu1 %v812_v46 }
  0x38   :  { %515 = vmatpush.bf16.msrb.mxu0 %v803_v47 }
  0x39   :  { %528 = vmatpush.bf16.msrb.mxu1 %v811_v48 }
  0x3c   :  { %516 = vmatpush.bf16.msrb.mxu0 %v802_v49 }
  0x3d   :  { %529 = vmatpush.bf16.msrb.mxu1 %v810_v51  ;;  %766 = vmatmul.msk.bf16.vlgmr.msrb.gmra.mxu2 %vm456_vm0, %v59_v52 }
  0x40   :  { %517 = vmatpush.bf16.msrb.mxu0 %v801_v53 }
  0x41   :  { %530 = vmatpush.bf16.msrb.mxu1 %v809_v54 }
  0x44   :  { %518 = vmatpush.bf16.msrb.mxu0 %v800_v55 }
  0x45   :  { %531 = vmatpush.bf16.msrb.mxu1 %v808_v56 }
  0x48   :  { %519 = vmatpush.bf16.msrb.mxu0 %v799_v57 }
  0x49   :  { %532 = vmatpush.bf16.msrb.mxu1 %v807_v59 }
  0x4b   :  { %520 = vmatmul.bf16.vlgmr.msrb.gmra.mxu0 %v57_v61 }
  0x4c   :  { %533 = vmatmul.bf16.vlgmr.msrb.gmra.mxu1 %v58_v62 }
  0xa8   :  { %v469_v63 = vpop.f32.mrf.mxu0 }
  0xa9   :  { %v482_v0 = vpop.f32.mrf.mxu1  ;;  %v470_v7 = vadd.f32 %v821_v5, %v469_v63 }
  0xab   :  { %v483_v9 = vadd.f32 %v482_v0, %v470_v7 }
  0xb0   :  { %v495_v1 = vpop.f32.mrf.mxu2  ;;  %v471_v2 = vpop.f32.mrf.mxu0 }
  0xb1   :  { %v484_v3 = vpop.f32.mrf.mxu1  ;;  %v508_v4 = vpop.f32.mrf.mxu3  ;;  %v496_v11 = vadd.f32 %v495_v1, %v483_v9 }
  0xb3   :  { %v509_v12 = vadd.f32 %v508_v4, %v496_v11 }
  0xb8   :  { %v497_v6 = vpop.f32.mrf.mxu2 }
  0xb9   :  { %v510_v8 = vpop.f32.mrf.mxu3 }
  0xc0   :  { %v547_v10 = vpop.f32.mrf.mxu2 }
  0xc8   :  { %v521_v13 = vpop.f32.mrf.mxu0  ;;  %v549_v16 = vpop.f32.mrf.mxu2 }
  0xc9   :  { %v522_v14 = vadd.f32 %v521_v13, %v509_v12  ;;  %v534_v15 = vpop.f32.mrf.mxu1 }
  0xcb   :  { %v535_v17 = vadd.f32 %v534_v15, %v522_v14 }
  0xcd   :  { %v548_v18 = vadd.f32 %v547_v10, %v535_v17 }
  0xcf   :  { %551 = vst [vmem:[#allocation7] sm:$0xff] %v548_v18 }
  0xd0   :  { %v523_v19 = vpop.f32.mrf.mxu0  ;;  %562 = dma.vmem_to_hbm [thread:$0]  %s558_s25, 128, %s560_s28, [#allocation4]  }
  0xd1   :  { %v536_v20 = vpop.f32.mrf.mxu1 }
  0xd2   :  { %898 = dma.done.wait [#allocation4], 128  }
  0xd3   :  { %899 = vsyncadd [#allocation4], 4294967168 }
  0xd4   :  { %567 = vsyncpa [#allocation3], 1 }
  0xd5   :  { %568 = vsyncpa [#allocation6], 1 }
  0xd6   :  { %569 = vsyncpa [#allocation4], 1 }

</bundles_post_ra>
